<compile_context>
chip_gen: v5e
topology: v5e:2x2
jax: 0.10.0
libtpu: 0.0.40
codegen_flags: <defaults>
</compile_context>

<pallas_src>
import functools

import jax
import jax.numpy as jnp
from jax.experimental import pallas as pl
from jax.experimental.pallas import tpu as pltpu


def _round_up(n, m):
    return ((n + m - 1) // m) * m


def _encoder_kernel(n_hidden, act_dtype, x_ref, *refs):
    """Fused MLP: in_fc -> relu -> [hidden -> relu]*n_hidden -> fused heads.

    refs = [W_in, b_in, (W_h, b_h) * n_hidden, W_head, b_head, out]
    Matmuls run on the MXU with f32 accumulation; bias-add/relu on the VPU in
    f32; the inter-layer activation is carried in `act_dtype` (= weight dtype).
    """
    out_ref = refs[-1]
    params = refs[:-1]

    w_in = params[0][...]
    b_in = params[1][...]
    # x already carries the weight dtype (cast fused into the wrapper-side pad).
    h = jnp.dot(x_ref[...], w_in, preferred_element_type=jnp.float32)
    h = jnp.maximum(h + b_in, 0.0).astype(act_dtype)

    idx = 2
    for _ in range(n_hidden):
        w = params[idx][...]
        b = params[idx + 1][...]
        h = jnp.dot(h, w, preferred_element_type=jnp.float32)
        h = jnp.maximum(h + b, 0.0).astype(act_dtype)
        idx += 2

    # Fused (mu | logvar) head: one lane-dense matmul + unmasked 128-lane store.
    w_head = params[idx][...]
    b_head = params[idx + 1][...]
    out = jnp.dot(h, w_head, preferred_element_type=jnp.float32) + b_head
    out_ref[...] = out.astype(out_ref.dtype)


def init_encoder_params(key, in_dim, mu_out_dim, logvar_out_dim, hidden_layers,
                        dtype=jnp.float32):
    """nn.Linear-style init (uniform +-1/sqrt(fan_in)), weights stored (in, out).

    Returns a flat list: [W_in, b_in, (W_h, b_h)..., W_mu, b_mu, W_logvar, b_logvar]
    (UNPADDED; use pad_and_fuse_params() to build kernel-ready params).
    """
    dims = [(in_dim, hidden_layers[0])]
    for i in range(len(hidden_layers) - 1):
        dims.append((hidden_layers[i], hidden_layers[i + 1]))
    head_in = hidden_layers[-1]
    dims.append((head_in, mu_out_dim))      # mu head
    dims.append((head_in, logvar_out_dim))  # logvar head

    params = []
    keys = jax.random.split(key, 2 * len(dims))
    for j, (fan_in, fan_out) in enumerate(dims):
        bound = 1.0 / jnp.sqrt(jnp.asarray(fan_in, jnp.float32))
        w = jax.random.uniform(keys[2 * j], (fan_in, fan_out), dtype,
                               minval=-bound, maxval=bound)
        b = jax.random.uniform(keys[2 * j + 1], (1, fan_out), dtype,
                               minval=-bound, maxval=bound)
        params.append(w)
        params.append(b)
    return params


def pad_and_fuse_params(params, weight_dtype=jnp.bfloat16, lane=128, in_sublane=8):
    """Zero-pad feature dims and fuse the two heads into one weight/bias.

    Hidden/output dims are padded to multiples of `lane`; the FIRST layer's
    contraction dim (the raw input width) only to a multiple of `in_sublane`,
    so small in_dim does not blow up x HBM traffic. Weights are cast to
    `weight_dtype` (bf16 is the fast path on every TPU generation); biases
    stay f32 so the VPU epilogue is f32 everywhere.
    Returns [W_in_p, b_in_p, (W_h_p, b_h_p)..., W_head_p, b_head_p].
    """
    def pad_w(w, rows, cols):
        r, c = w.shape
        return jnp.pad(w, ((0, rows - r), (0, cols - c))).astype(weight_dtype)

    def pad_b(b, cols):
        return jnp.pad(b, ((0, 0), (0, cols - b.shape[1]))).astype(jnp.float32)

    # params = [W_in, b_in, hidden..., W_mu, b_mu, W_lv, b_lv]
    body = params[:-4]
    w_mu, b_mu, w_lv, b_lv = params[-4:]

    kparams = []
    first = True
    for j in range(0, len(body), 2):
        w, b = body[j], body[j + 1]
        row_mult = in_sublane if first else lane
        rows = _round_up(w.shape[0], row_mult)
        cols = _round_up(w.shape[1], lane)
        kparams.append(pad_w(w, rows, cols))
        kparams.append(pad_b(b, cols))
        first = False

    # Fuse heads: [W_mu | W_logvar] -> one (head_in, mu+logvar) matmul.
    # NOTE: concatenation happens BEFORE padding — the wrapper's head slicing
    # (out[:, :mu], out[:, mu:mu+lv]) relies on this invariant.
    w_head = jnp.concatenate([w_mu, w_lv], axis=1)
    b_head = jnp.concatenate([b_mu, b_lv], axis=1)
    rows = _round_up(w_head.shape[0], lane)
    cols = _round_up(w_head.shape[1], lane)
    kparams.append(pad_w(w_head, rows, cols))
    kparams.append(pad_b(b_head, cols))
    return kparams


def encoder_forward(x, kparams, mu_out_dim, logvar_out_dim, hidden_layers, *,
                    batch_tile=None, out_dtype=None):
    """Fused Encoder forward. Returns (mu_out, logvar_out), shapes (B, *_out_dim)."""
    B, in_dim = x.shape
    n_hidden = len(hidden_layers) - 1
    in_pad = kparams[0].shape[0]
    out_pad = kparams[-1].shape[1]  # padded fused-head width
    w_dtype = kparams[0].dtype
    out_dtype = jnp.dtype(out_dtype) if out_dtype is not None else x.dtype

    # Batch tiling: multiples of 8 (sublanes). For B > 8 rows aim for >=2 grid
    # steps so ("parallel",) can shard across v7x's two TensorCores; cap the
    # tile at 1024 rows so single-TC chips (v5e/v6e) amortize the ~0.35 us/step
    # pipeline overhead while keeping x/out tile VMEM modest.
    B8 = _round_up(B, 8)
    if batch_tile is None:
        batch_tile = B8 if B8 <= 8 else min(_round_up(pl.cdiv(B8, 2), 8), 1024)
    tb = _round_up(min(batch_tile, B8), 8)
    B_pad = _round_up(B, tb)

    # Pad x to (B_pad, in_pad) and fuse the cast to the weight dtype into the
    # pad copy: the kernel's x DMA then moves half the bytes when weights are
    # bf16 and the per-step in-kernel cast disappears. Padded rows/cols are
    # zeros and never read back.
    x_p = jnp.pad(x, ((0, B_pad - B), (0, in_pad - in_dim))).astype(w_dtype)

    x_spec = pl.BlockSpec((tb, in_pad), lambda i: (i, 0))
    out_spec = pl.BlockSpec((tb, out_pad), lambda i: (i, 0))

    # Advisory cost estimate for XLA scheduling around this custom call.
    weights = kparams[0::2]
    flops = sum(2 * B_pad * int(w.shape[0]) * int(w.shape[1]) for w in weights)
    bytes_accessed = int(x_p.size) * x_p.dtype.itemsize
    bytes_accessed += sum(int(p.size) * p.dtype.itemsize for p in kparams)
    bytes_accessed += B_pad * out_pad * out_dtype.itemsize
    cost = pl.CostEstimate(flops=int(flops), transcendentals=0,
                           bytes_accessed=int(bytes_accessed))

    kernel = functools.partial(_encoder_kernel, n_hidden, w_dtype)

    def _vmem_limit(param_buffers):
        # resident params (x buffer count) + double-buffered x/out tiles +
        # a few live f32 activation temporaries + margin, capped under the
        # physical per-core VMEM (64 MiB on v7x, 128 MiB on v5e/v6e).
        param_bytes = param_buffers * sum(int(p.size) * p.dtype.itemsize
                                          for p in kparams)
        io_bytes = 2 * tb * (in_pad * x_p.dtype.itemsize
                             + out_pad * out_dtype.itemsize)
        max_w = max(int(kparams[i].shape[1]) for i in range(0, len(kparams), 2))
        act_bytes = 4 * tb * max_w * 4
        needed = param_bytes + io_bytes + act_bytes + (4 << 20)
        try:
            cap = int(pltpu.get_tpu_info().vmem_capacity_bytes)
        except Exception:
            cap = 64 << 20  # conservative v7x per-TC floor
        return int(min(max(needed, 32 << 20), int(cap * 0.85)))

    def _build(single_buffer_params):
        if single_buffer_params:
            # Constant weights/biases: whole-array blocks, resident across the
            # batch axis, single-buffered (never re-fetched) to halve VMEM use.
            param_specs = [pl.BlockSpec(p.shape, lambda i: (0, 0),
                                        pipeline_mode=pl.Buffered(1))
                           for p in kparams]
        else:
            param_specs = [pl.BlockSpec(p.shape, lambda i: (0, 0))
                           for p in kparams]
        return pl.pallas_call(
            kernel,
            out_shape=jax.ShapeDtypeStruct((B_pad, out_pad), out_dtype),
            grid_spec=pltpu.PrefetchScalarGridSpec(
                num_scalar_prefetch=0,
                grid=(B_pad // tb,),
                in_specs=[x_spec] + param_specs,
                out_specs=out_spec,
            ),
            compiler_params=pltpu.CompilerParams(
                dimension_semantics=("parallel",),
                vmem_limit_bytes=_vmem_limit(1 if single_buffer_params else 2)),
            cost_estimate=cost,
        )

    try:
        out_full = _build(True)(x_p, *kparams)
    except Exception:
        # Fallback if this JAX build rejects Buffered(1) on constant blocks:
        # default double-buffering (identical numerics, more VMEM).
        out_full = _build(False)(x_p, *kparams)

    mu_out = out_full[:B, :mu_out_dim]
    logvar_out = out_full[:B, mu_out_dim:mu_out_dim + logvar_out_dim]
    return mu_out, logvar_out


def encoder_reference(x, params, n_hidden):
    """Pure-JAX reference of the PyTorch Encoder.forward (unpadded params)."""
    w_in, b_in = params[0], params[1]
    h = jax.nn.relu(x @ w_in + b_in)
    idx = 2
    for _ in range(n_hidden):
        w, b = params[idx], params[idx + 1]
        h = jax.nn.relu(h @ w + b)
        idx += 2
    w_mu, b_mu = params[idx], params[idx + 1]
    w_lv, b_lv = params[idx + 2], params[idx + 3]
    return h @ w_mu + b_mu, h @ w_lv + b_lv


if __name__ == "__main__":
    # Small shapes consistent with the module: x is (batch, in_dim).
    in_dim = 32
    hidden_layers = [64, 64]
    mu_out_dim = 16
    logvar_out_dim = 16
    n_hidden = len(hidden_layers) - 1

    key = jax.random.PRNGKey(0)
    k_x, k_x2, k_p = jax.random.split(key, 3)
    params = init_encoder_params(k_p, in_dim, mu_out_dim, logvar_out_dim,
                                 hidden_layers)

    # --- Exact path: f32 weights / f32 activations / f32 output slab. ---
    x = jax.random.normal(k_x, (8, in_dim), jnp.float32)
    ref_mu, ref_lv = encoder_reference(x, params, n_hidden)
    kp_f32 = pad_and_fuse_params(params, weight_dtype=jnp.float32)
    mu_out, lv_out = encoder_forward(x, kp_f32, mu_out_dim, logvar_out_dim,
                                     hidden_layers)
    jax.block_until_ready((mu_out, lv_out))
    assert mu_out.shape == (8, mu_out_dim)
    assert lv_out.shape == (8, logvar_out_dim)
    assert jnp.allclose(mu_out, ref_mu, atol=1e-5, rtol=1e-5)
    assert jnp.allclose(lv_out, ref_lv, atol=1e-5, rtol=1e-5)

    # --- Fast path: bf16 weights + bf16 activation carry + bf16 output slab. ---
    kp_bf16 = pad_and_fuse_params(params, weight_dtype=jnp.bfloat16)
    mu_bf, lv_bf = encoder_forward(x, kp_bf16, mu_out_dim, logvar_out_dim,
                                   hidden_layers, out_dtype=jnp.bfloat16)
    jax.block_until_ready((mu_bf, lv_bf))
    assert mu_bf.dtype == jnp.bfloat16 and lv_bf.dtype == jnp.bfloat16
    assert jnp.allclose(mu_bf.astype(jnp.float32), ref_mu, atol=1e-1, rtol=1e-1)
    assert jnp.allclose(lv_bf.astype(jnp.float32), ref_lv, atol=1e-1, rtol=1e-1)

    # --- Multi-tile grid (>=2 steps -> both v7x TCs) + padded batch rows. ---
    x2 = jax.random.normal(k_x2, (24, in_dim), jnp.float32)
    ref_mu2, ref_lv2 = encoder_reference(x2, params, n_hidden)
    mu2, lv2 = encoder_forward(x2, kp_f32, mu_out_dim, logvar_out_dim,
                               hidden_layers)
    jax.block_until_ready((mu2, lv2))
    assert mu2.shape == (24, mu_out_dim)
    assert lv2.shape == (24, logvar_out_dim)
    assert jnp.allclose(mu2, ref_mu2, atol=1e-5, rtol=1e-5)
    assert jnp.allclose(lv2, ref_lv2, atol=1e-5, rtol=1e-5)

    print("KERNEL_OK")
</pallas_src>

<mosaic_0001>
module attributes {stable_mosaic.version = 11 : i64} {
  func.func @_encoder_kernel(%arg0: i32, %arg1: memref<8x32xf32, #tpu.memory_space<vmem>>, %arg2: memref<32x128xf32, #tpu.memory_space<vmem>>, %arg3: memref<1x128xf32, #tpu.memory_space<vmem>>, %arg4: memref<128x128xf32, #tpu.memory_space<vmem>>, %arg5: memref<1x128xf32, #tpu.memory_space<vmem>>, %arg6: memref<128x128xf32, #tpu.memory_space<vmem>>, %arg7: memref<1x128xf32, #tpu.memory_space<vmem>>, %arg8: memref<8x128xf32, #tpu.memory_space<vmem>>) attributes {dimension_semantics = [#tpu.dimension_semantics<parallel>], iteration_bounds = array<i64: 1>, scalar_prefetch = 0 : i64, scratch_operands = 0 : i64, tpu.core_type = #tpu.core_type<tc>, window_params = [{transform_indices = @transform_0, window_bounds = array<i64: 8, 32>}, {pipeline_mode = #tpu.pipeline_mode<synchronous>, transform_indices = @transform_1, window_bounds = array<i64: 32, 128>}, {pipeline_mode = #tpu.pipeline_mode<synchronous>, transform_indices = @transform_2, window_bounds = array<i64: 1, 128>}, {pipeline_mode = #tpu.pipeline_mode<synchronous>, transform_indices = @transform_3, window_bounds = array<i64: 128, 128>}, {pipeline_mode = #tpu.pipeline_mode<synchronous>, transform_indices = @transform_4, window_bounds = array<i64: 1, 128>}, {pipeline_mode = #tpu.pipeline_mode<synchronous>, transform_indices = @transform_5, window_bounds = array<i64: 128, 128>}, {pipeline_mode = #tpu.pipeline_mode<synchronous>, transform_indices = @transform_6, window_bounds = array<i64: 1, 128>}, {transform_indices = @transform_7, window_bounds = array<i64: 8, 128>}]} {
    %c0 = arith.constant 0 : index
    %c0_0 = arith.constant 0 : index
    %0 = vector.load %arg2[%c0, %c0_0] : memref<32x128xf32, #tpu.memory_space<vmem>>, vector<32x128xf32>
    %c0_1 = arith.constant 0 : index
    %c0_2 = arith.constant 0 : index
    %1 = vector.load %arg3[%c0_1, %c0_2] : memref<1x128xf32, #tpu.memory_space<vmem>>, vector<1x128xf32>
    %c0_3 = arith.constant 0 : index
    %c0_4 = arith.constant 0 : index
    %2 = vector.load %arg1[%c0_3, %c0_4] : memref<8x32xf32, #tpu.memory_space<vmem>>, vector<8x32xf32>
    %cst = arith.constant dense<0.000000e+00> : vector<8x128xf32>
    %3 = tpu.matmul %2, %0, %cst {dimension_numbers = #tpu.dot_dimension_numbers<[1], [0], [0], [1], [0, 0, 1, 1], [], []>} : vector<8x32xf32>, vector<32x128xf32>, vector<8x128xf32> -> vector<8x128xf32>
    %4 = vector.broadcast %1 : vector<1x128xf32> to vector<8x128xf32>
    %5 = arith.addf %3, %4 : vector<8x128xf32>
    %cst_5 = arith.constant 0.000000e+00 : f32
    %6 = vector.broadcast %cst_5 : f32 to vector<8x128xf32>
    %7 = arith.maximumf %5, %6 : vector<8x128xf32>
    %c0_6 = arith.constant 0 : index
    %c0_7 = arith.constant 0 : index
    %8 = vector.load %arg4[%c0_6, %c0_7] : memref<128x128xf32, #tpu.memory_space<vmem>>, vector<128x128xf32>
    %c0_8 = arith.constant 0 : index
    %c0_9 = arith.constant 0 : index
    %9 = vector.load %arg5[%c0_8, %c0_9] : memref<1x128xf32, #tpu.memory_space<vmem>>, vector<1x128xf32>
    %cst_10 = arith.constant dense<0.000000e+00> : vector<8x128xf32>
    %10 = tpu.matmul %7, %8, %cst_10 {dimension_numbers = #tpu.dot_dimension_numbers<[1], [0], [0], [1], [0, 0, 1, 1], [], []>} : vector<8x128xf32>, vector<128x128xf32>, vector<8x128xf32> -> vector<8x128xf32>
    %11 = vector.broadcast %9 : vector<1x128xf32> to vector<8x128xf32>
    %12 = arith.addf %10, %11 : vector<8x128xf32>
    %cst_11 = arith.constant 0.000000e+00 : f32
    %13 = vector.broadcast %cst_11 : f32 to vector<8x128xf32>
    %14 = arith.maximumf %12, %13 : vector<8x128xf32>
    %c0_12 = arith.constant 0 : index
    %c0_13 = arith.constant 0 : index
    %15 = vector.load %arg6[%c0_12, %c0_13] : memref<128x128xf32, #tpu.memory_space<vmem>>, vector<128x128xf32>
    %c0_14 = arith.constant 0 : index
    %c0_15 = arith.constant 0 : index
    %16 = vector.load %arg7[%c0_14, %c0_15] : memref<1x128xf32, #tpu.memory_space<vmem>>, vector<1x128xf32>
    %cst_16 = arith.constant dense<0.000000e+00> : vector<8x128xf32>
    %17 = tpu.matmul %14, %15, %cst_16 {dimension_numbers = #tpu.dot_dimension_numbers<[1], [0], [0], [1], [0, 0, 1, 1], [], []>} : vector<8x128xf32>, vector<128x128xf32>, vector<8x128xf32> -> vector<8x128xf32>
    %18 = vector.broadcast %16 : vector<1x128xf32> to vector<8x128xf32>
    %19 = arith.addf %17, %18 : vector<8x128xf32>
    %c0_17 = arith.constant 0 : index
    %c0_18 = arith.constant 0 : index
    %20 = vector.load %arg8[%c0_17, %c0_18] : memref<8x128xf32, #tpu.memory_space<vmem>>, vector<8x128xf32>
    tpu.vector_store %arg8[%c0_17, %c0_18], %19 {strides = array<i32>} : memref<8x128xf32, #tpu.memory_space<vmem>>, vector<8x128xf32>,
    return
  }
  func.func @transform_0(%arg0: i32) -> (i32, i32) {
    %c0_i32 = arith.constant 0 : i32
    %c0_i32_0 = arith.constant 0 : i32
    return %arg0, %c0_i32 : i32, i32
  }
  func.func @transform_1(%arg0: i32) -> (i32, i32) {
    %c0_i32 = arith.constant 0 : i32
    %c0_i32_0 = arith.constant 0 : i32
    %c0_i32_1 = arith.constant 0 : i32
    return %c0_i32, %c0_i32_0 : i32, i32
  }
  func.func @transform_2(%arg0: i32) -> (i32, i32) {
    %c0_i32 = arith.constant 0 : i32
    %c0_i32_0 = arith.constant 0 : i32
    %c0_i32_1 = arith.constant 0 : i32
    return %c0_i32, %c0_i32_0 : i32, i32
  }
  func.func @transform_3(%arg0: i32) -> (i32, i32) {
    %c0_i32 = arith.constant 0 : i32
    %c0_i32_0 = arith.constant 0 : i32
    %c0_i32_1 = arith.constant 0 : i32
    return %c0_i32, %c0_i32_0 : i32, i32
  }
  func.func @transform_4(%arg0: i32) -> (i32, i32) {
    %c0_i32 = arith.constant 0 : i32
    %c0_i32_0 = arith.constant 0 : i32
    %c0_i32_1 = arith.constant 0 : i32
    return %c0_i32, %c0_i32_0 : i32, i32
  }
  func.func @transform_5(%arg0: i32) -> (i32, i32) {
    %c0_i32 = arith.constant 0 : i32
    %c0_i32_0 = arith.constant 0 : i32
    %c0_i32_1 = arith.constant 0 : i32
    return %c0_i32, %c0_i32_0 : i32, i32
  }
  func.func @transform_6(%arg0: i32) -> (i32, i32) {
    %c0_i32 = arith.constant 0 : i32
    %c0_i32_0 = arith.constant 0 : i32
    %c0_i32_1 = arith.constant 0 : i32
    return %c0_i32, %c0_i32_0 : i32, i32
  }
  func.func @transform_7(%arg0: i32) -> (i32, i32) {
    %c0_i32 = arith.constant 0 : i32
    %c0_i32_0 = arith.constant 0 : i32
    return %arg0, %c0_i32 : i32, i32
  }
}

module attributes {stable_mosaic.version = 11 : i64} {
  func.func @_encoder_kernel(%arg0: i32, %arg1: memref<8x32xf32, #tpu.memory_space<vmem>>, %arg2: memref<32x128xf32, #tpu.memory_space<vmem>>, %arg3: memref<1x128xf32, #tpu.memory_space<vmem>>, %arg4: memref<128x128xf32, #tpu.memory_space<vmem>>, %arg5: memref<1x128xf32, #tpu.memory_space<vmem>>, %arg6: memref<128x128xf32, #tpu.memory_space<vmem>>, %arg7: memref<1x128xf32, #tpu.memory_space<vmem>>, %arg8: memref<8x128xf32, #tpu.memory_space<vmem>>) attributes {dimension_semantics = [#tpu.dimension_semantics<parallel>], iteration_bounds = array<i64: 1>, scalar_prefetch = 0 : i64, scratch_operands = 0 : i64, tpu.core_type = #tpu.core_type<tc>, window_params = [{transform_indices = @transform_0, window_bounds = array<i64: 8, 32>}, {pipeline_mode = #tpu.pipeline_mode<synchronous>, transform_indices = @transform_1, window_bounds = array<i64: 32, 128>}, {pipeline_mode = #tpu.pipeline_mode<synchronous>, transform_indices = @transform_2, window_bounds = array<i64: 1, 128>}, {pipeline_mode = #tpu.pipeline_mode<synchronous>, transform_indices = @transform_3, window_bounds = array<i64: 128, 128>}, {pipeline_mode = #tpu.pipeline_mode<synchronous>, transform_indices = @transform_4, window_bounds = array<i64: 1, 128>}, {pipeline_mode = #tpu.pipeline_mode<synchronous>, transform_indices = @transform_5, window_bounds = array<i64: 128, 128>}, {pipeline_mode = #tpu.pipeline_mode<synchronous>, transform_indices = @transform_6, window_bounds = array<i64: 1, 128>}, {transform_indices = @transform_7, window_bounds = array<i64: 8, 128>}]} {
    %c0 = arith.constant 0 : index
    %c0_0 = arith.constant 0 : index
    %0 = vector.load %arg2[%c0, %c0_0] : memref<32x128xf32, #tpu.memory_space<vmem>>, vector<32x128xf32>
    %c0_1 = arith.constant 0 : index
    %c0_2 = arith.constant 0 : index
    %1 = vector.load %arg3[%c0_1, %c0_2] : memref<1x128xf32, #tpu.memory_space<vmem>>, vector<1x128xf32>
    %c0_3 = arith.constant 0 : index
    %c0_4 = arith.constant 0 : index
    %2 = vector.load %arg1[%c0_3, %c0_4] : memref<8x32xf32, #tpu.memory_space<vmem>>, vector<8x32xf32>
    %cst = arith.constant dense<0.000000e+00> : vector<8x128xf32>
    %3 = tpu.matmul %2, %0, %cst {dimension_numbers = #tpu.dot_dimension_numbers<[1], [0], [0], [1], [0, 0, 1, 1], [], []>} : vector<8x32xf32>, vector<32x128xf32>, vector<8x128xf32> -> vector<8x128xf32>
    %4 = vector.broadcast %1 : vector<1x128xf32> to vector<8x128xf32>
    %5 = arith.addf %3, %4 : vector<8x128xf32>
    %cst_5 = arith.constant 0.000000e+00 : f32
    %6 = vector.broadcast %cst_5 : f32 to vector<8x128xf32>
    %7 = arith.maximumf %5, %6 : vector<8x128xf32>
    %c0_6 = arith.constant 0 : index
    %c0_7 = arith.constant 0 : index
    %8 = vector.load %arg4[%c0_6, %c0_7] : memref<128x128xf32, #tpu.memory_space<vmem>>, vector<128x128xf32>
    %c0_8 = arith.constant 0 : index
    %c0_9 = arith.constant 0 : index
    %9 = vector.load %arg5[%c0_8, %c0_9] : memref<1x128xf32, #tpu.memory_space<vmem>>, vector<1x128xf32>
    %cst_10 = arith.constant dense<0.000000e+00> : vector<8x128xf32>
    %10 = tpu.matmul %7, %8, %cst_10 {dimension_numbers = #tpu.dot_dimension_numbers<[1], [0], [0], [1], [0, 0, 1, 1], [], []>} : vector<8x128xf32>, vector<128x128xf32>, vector<8x128xf32> -> vector<8x128xf32>
    %11 = vector.broadcast %9 : vector<1x128xf32> to vector<8x128xf32>
    %12 = arith.addf %10, %11 : vector<8x128xf32>
    %cst_11 = arith.constant 0.000000e+00 : f32
    %13 = vector.broadcast %cst_11 : f32 to vector<8x128xf32>
    %14 = arith.maximumf %12, %13 : vector<8x128xf32>
    %c0_12 = arith.constant 0 : index
    %c0_13 = arith.constant 0 : index
    %15 = vector.load %arg6[%c0_12, %c0_13] : memref<128x128xf32, #tpu.memory_space<vmem>>, vector<128x128xf32>
    %c0_14 = arith.constant 0 : index
    %c0_15 = arith.constant 0 : index
    %16 = vector.load %arg7[%c0_14, %c0_15] : memref<1x128xf32, #tpu.memory_space<vmem>>, vector<1x128xf32>
    %cst_16 = arith.constant dense<0.000000e+00> : vector<8x128xf32>
    %17 = tpu.matmul %14, %15, %cst_16 {dimension_numbers = #tpu.dot_dimension_numbers<[1], [0], [0], [1], [0, 0, 1, 1], [], []>} : vector<8x128xf32>, vector<128x128xf32>, vector<8x128xf32> -> vector<8x128xf32>
    %18 = vector.broadcast %16 : vector<1x128xf32> to vector<8x128xf32>
    %19 = arith.addf %17, %18 : vector<8x128xf32>
    %c0_17 = arith.constant 0 : index
    %c0_18 = arith.constant 0 : index
    %20 = vector.load %arg8[%c0_17, %c0_18] : memref<8x128xf32, #tpu.memory_space<vmem>>, vector<8x128xf32>
    tpu.vector_store %arg8[%c0_17, %c0_18], %19 {strides = array<i32>} : memref<8x128xf32, #tpu.memory_space<vmem>>, vector<8x128xf32>,
    return
  }
  func.func @transform_0(%arg0: i32) -> (i32, i32) {
    %c0_i32 = arith.constant 0 : i32
    %c0_i32_0 = arith.constant 0 : i32
    return %arg0, %c0_i32 : i32, i32
  }
  func.func @transform_1(%arg0: i32) -> (i32, i32) {
    %c0_i32 = arith.constant 0 : i32
    %c0_i32_0 = arith.constant 0 : i32
    %c0_i32_1 = arith.constant 0 : i32
    return %c0_i32, %c0_i32_0 : i32, i32
  }
  func.func @transform_2(%arg0: i32) -> (i32, i32) {
    %c0_i32 = arith.constant 0 : i32
    %c0_i32_0 = arith.constant 0 : i32
    %c0_i32_1 = arith.constant 0 : i32
    return %c0_i32, %c0_i32_0 : i32, i32
  }
  func.func @transform_3(%arg0: i32) -> (i32, i32) {
    %c0_i32 = arith.constant 0 : i32
    %c0_i32_0 = arith.constant 0 : i32
    %c0_i32_1 = arith.constant 0 : i32
    return %c0_i32, %c0_i32_0 : i32, i32
  }
  func.func @transform_4(%arg0: i32) -> (i32, i32) {
    %c0_i32 = arith.constant 0 : i32
    %c0_i32_0 = arith.constant 0 : i32
    %c0_i32_1 = arith.constant 0 : i32
    return %c0_i32, %c0_i32_0 : i32, i32
  }
  func.func @transform_5(%arg0: i32) -> (i32, i32) {
    %c0_i32 = arith.constant 0 : i32
    %c0_i32_0 = arith.constant 0 : i32
    %c0_i32_1 = arith.constant 0 : i32
    return %c0_i32, %c0_i32_0 : i32, i32
  }
  func.func @transform_6(%arg0: i32) -> (i32, i32) {
    %c0_i32 = arith.constant 0 : i32
    %c0_i32_0 = arith.constant 0 : i32
    %c0_i32_1 = arith.constant 0 : i32
    return %c0_i32, %c0_i32_0 : i32, i32
  }
  func.func @transform_7(%arg0: i32) -> (i32, i32) {
    %c0_i32 = arith.constant 0 : i32
    %c0_i32_0 = arith.constant 0 : i32
    return %arg0, %c0_i32 : i32, i32
  }
}

</mosaic_0001>

<bundles_post_ra>
// kernel: tpu_custom_call.1
= control target key start
LH: loop header
LB: loop body
LE: loop exit
PB: predicated region body
PF: predicated region fallthrough
CT: control target
= control target key end

     0   :  { %12 = vsyncpa [#allocation3], 0  ;;  %s433_s0 = inlined_call_operand.hbm [shape: f32[8,32], index: 0, kind: input, shape index: {}]   ;;  %s434_s1 = inlined_call_operand.hbm [shape: f32[32,128], index: 1, kind: input, shape index: {}]   ;;  %s435_s2 = inlined_call_operand.vmem [shape: f32[1,128], index: 2, kind: input, shape index: {}]   ;;  %s436_s3 = inlined_call_operand.hbm [shape: f32[128,128], index: 3, kind: input, shape index: {}]   ;;  %s437_s4 = inlined_call_operand.vmem [shape: f32[1,128], index: 4, kind: input, shape index: {}]   ;;  %s438_s5 = inlined_call_operand.hbm [shape: f32[128,128], index: 5, kind: input, shape index: {}]   ;;  %s439_s6 = inlined_call_operand.vmem [shape: f32[1,128], index: 6, kind: input, shape index: {}]   ;;  %s440_s7 = inlined_call_operand.hbm [shape: f32[8,128], index: 7, kind: output, shape index: {}]  }
   0x1   :  { %13 = vsyncpa [#allocation6], 0 }
   0x2   :  { %14 = vsyncpa [#allocation9], 0  ;;  %s31_s26 = sshll.u32 %s434_s1, 4  ;;  %s32_s26 = int_to_ptr.hbm [resolvable:$true] %s31_s26 }
   0x3   :  { %15 = vsyncpa [#allocation4], 0  ;;  %s362_s27 = smov [#allocation5]   ;;  %s21_s8 = sshll.u32 %s433_s0, 4  ;;  %s22_s8 = int_to_ptr.hbm [resolvable:$true] %s21_s8 }
   0x4   :  { %s33_s28 = sshll.u32 %s362_s27, 4  ;;  %s363_s9 = smov 128   ;;  %s34_s28 = int_to_ptr.vmem [resolvable:$true] %s33_s28 }
   0x5   :  { %s364_s10 = smov 8   ;;  %s365_s11 = smov [#allocation2]  }
   0x6   :  { %39 = dma.hbm_to_vmem [thread:$0]  %s32_s26, 512, %s34_s28, [#allocation6], %s363_s9, %s363_s9, %s364_s10  }
   0x7   :  { %s23_s12 = sshll.u32 %s365_s11, 4  ;;  %s46_s15 = sshll.u32 %s436_s3, 4  ;;  %s24_s12 = int_to_ptr.vmem [resolvable:$true] %s23_s12  ;;  %s47_s15 = int_to_ptr.hbm [resolvable:$true] %s46_s15 }
   0x8   :  { %26 = dma.hbm_to_vmem [thread:$0]  %s22_s8, 128, %s24_s12, [#allocation3]  }
   0x9   :  { %s61_s17 = sshll.u32 %s438_s5, 4  ;;  %s366_s18 = smov [#allocation7]   ;;  %s62_s17 = int_to_ptr.hbm [resolvable:$true] %s61_s17 }
   0xa   :  { %s48_s19 = sshll.u32 %s366_s18, 4  ;;  %s367_s0 = smov [#allocation8]   ;;  %s49_s19 = int_to_ptr.vmem [resolvable:$true] %s48_s19 }
   0xb   :  { %54 = dma.hbm_to_vmem [thread:$0]  %s47_s15, 2048, %s49_s19, [#allocation6], %s363_s9, %s363_s9, %s364_s10  }
   0xc   :  { %s63_s20 = sshll.u32 %s367_s0, 4  ;;  %s64_s20 = int_to_ptr.vmem [resolvable:$true] %s63_s20 }
   0xd   :  { %69 = dma.hbm_to_vmem [thread:$0]  %s62_s17, 2048, %s64_s20, [#allocation9], %s363_s9, %s363_s9, %s364_s10  }
   0xe   :  { %354 = dma.done.wait [#allocation3], 128  }
   0xf   :  { %355 = vsyncadd [#allocation3], 4294967168 }
  0x10   :  { %356 = dma.done.wait [#allocation6], 2560  }
  0x11   :  { %357 = vsyncadd [#allocation6], 4294964736 }
  0x12   :  { %358 = dma.done.wait [#allocation9], 2048  }
  0x13   :  { %359 = vsyncadd [#allocation9], 4294965248  ;;  %v91_v0 = vld [vmem:[#allocation5 + $0x18] sm:$0xff]  ;;  %v90_v1 = vld [vmem:[#allocation5 + $0x10] sm:$0xff]  ;;  %vm97_vm0 = vcmask 261120   ;;  %s368_s24 = smov [#allocation10]  }
  0x14   :  { %113 = vmatpush.msra.mxu0 %v91_v0  ;;  %v137_v2 = vld [vmem:[#allocation7 + $0x78] sm:$0xff]  ;;  %v89_v3 = vld [vmem:[#allocation5 + $0x8] sm:$0xff]  ;;  %v136_v4 = vld [vmem:[#allocation7 + $0x70] sm:$0xff]  ;;  %s209_s25 = sshll.u32 %s368_s24, 4  ;;  %s211_s28 = sshll.u32 %s440_s7, 4  ;;  %s210_s25 = int_to_ptr.vmem [resolvable:$true] %s209_s25  ;;  %s212_s28 = int_to_ptr.hbm [resolvable:$true] %s211_s28 }
  0x15   :  { %142 = vmatpush.msra.mxu1 %v137_v2  ;;  %v135_v5 = vld [vmem:[#allocation7 + $0x68] sm:$0xff]  ;;  %v88_v6 = vld [vmem:[#allocation5] sm:$0xff]  ;;  %v93_v7 = vld [vmem:[#allocation2] sm:$0xff] }
  0x16   :  { %114 = vmatpush.msra.mxu0 %v90_v1  ;;  %v134_v8 = vld [vmem:[#allocation7 + $0x60] sm:$0xff]  ;;  %v133_v9 = vld [vmem:[#allocation7 + $0x58] sm:$0xff]  ;;  %v132_v10 = vld [vmem:[#allocation7 + $0x50] sm:$0xff] }
  0x17   :  { %143 = vmatpush.msra.mxu1 %v136_v4  ;;  %v131_v11 = vld [vmem:[#allocation7 + $0x48] sm:$0xff]  ;;  %v130_v12 = vld [vmem:[#allocation7 + $0x40] sm:$0xff]  ;;  %v129_v13 = vld [vmem:[#allocation7 + $0x38] sm:$0xff] }
  0x18   :  { %115 = vmatpush.msra.mxu0 %v89_v3  ;;  %v128_v14 = vld [vmem:[#allocation7 + $0x30] sm:$0xff]  ;;  %v127_v15 = vld [vmem:[#allocation7 + $0x28] sm:$0xff]  ;;  %v126_v16 = vld [vmem:[#allocation7 + $0x20] sm:$0xff] }
  0x19   :  { %144 = vmatpush.msra.mxu1 %v135_v5  ;;  %v125_v17 = vld [vmem:[#allocation7 + $0x18] sm:$0xff]  ;;  %v124_v18 = vld [vmem:[#allocation7 + $0x10] sm:$0xff]  ;;  %v123_v19 = vld [vmem:[#allocation7 + $0x8] sm:$0xff] }
  0x1a   :  { %116 = vmatpush.msra.mxu0 %v88_v6  ;;  %v122_v20 = vld [vmem:[#allocation7] sm:$0xff]  ;;  %v178_v21 = vld [vmem:[#allocation8 + $0x78] sm:$0xff]  ;;  %v177_v22 = vld [vmem:[#allocation8 + $0x70] sm:$0xff] }
  0x1b   :  { %223 = vmatmul.msk.f32.vlgmr.msra.gmra.mxu0 %vm97_vm0, %v93_v7  ;;  %145 = vmatpush.msra.mxu1 %v134_v8  ;;  %v176_v23 = vld [vmem:[#allocation8 + $0x68] sm:$0xff]  ;;  %v175_v24 = vld [vmem:[#allocation8 + $0x60] sm:$0xff]  ;;  %v174_v25 = vld [vmem:[#allocation8 + $0x58] sm:$0xff] }
  0x1c   :  { %183 = vmatpush.msra.mxu2 %v178_v21  ;;  %v173_v26 = vld [vmem:[#allocation8 + $0x50] sm:$0xff]  ;;  %v172_v27 = vld [vmem:[#allocation8 + $0x48] sm:$0xff]  ;;  %v171_v28 = vld [vmem:[#allocation8 + $0x40] sm:$0xff] }
  0x1d   :  { %146 = vmatpush.msra.mxu1 %v133_v9  ;;  %v170_v29 = vld [vmem:[#allocation8 + $0x38] sm:$0xff]  ;;  %v169_v30 = vld [vmem:[#allocation8 + $0x30] sm:$0xff]  ;;  %v168_v31 = vld [vmem:[#allocation8 + $0x28] sm:$0xff] }
  0x1e   :  { %184 = vmatpush.msra.mxu2 %v177_v22  ;;  %v167_v32 = vld [vmem:[#allocation8 + $0x20] sm:$0xff]  ;;  %v166_v33 = vld [vmem:[#allocation8 + $0x18] sm:$0xff]  ;;  %v165_v38 = vld [vmem:[#allocation8 + $0x10] sm:$0xff] }
  0x1f   :  { %147 = vmatpush.msra.mxu1 %v132_v10  ;;  %v231_v34 = vld [vmem:[%s435_s2] ss:$0 sm:$0xff]  ;;  %v164_v39 = vld [vmem:[#allocation8 + $0x8] sm:$0xff]  ;;  %v163_v40 = vld [vmem:[#allocation8] sm:$0xff] }
  0x20   :  { %185 = vmatpush.msra.mxu2 %v176_v23  ;;  %v232_v41 = vld [vmem:[%s437_s4] ss:$0 sm:$0xff] }
  0x21   :  { %148 = vmatpush.msra.mxu1 %v131_v11  ;;  %v233_v45 = vld [vmem:[%s439_s6] ss:$0 sm:$0xff] }
  0x22   :  { %186 = vmatpush.msra.mxu2 %v175_v24 }
  0x23   :  { %149 = vmatpush.msra.mxu1 %v130_v12 }
  0x24   :  { %187 = vmatpush.msra.mxu2 %v174_v25 }
  0x25   :  { %150 = vmatpush.msra.mxu1 %v129_v13 }
  0x26   :  { %188 = vmatpush.msra.mxu2 %v173_v26 }
  0x27   :  { %151 = vmatpush.msra.mxu1 %v128_v14 }
  0x28   :  { %189 = vmatpush.msra.mxu2 %v172_v27 }
  0x29   :  { %152 = vmatpush.msra.mxu1 %v127_v15 }
  0x2a   :  { %190 = vmatpush.msra.mxu2 %v171_v28 }
  0x2b   :  { %153 = vmatpush.msra.mxu1 %v126_v16 }
  0x2c   :  { %191 = vmatpush.msra.mxu2 %v170_v29 }
  0x2d   :  { %154 = vmatpush.msra.mxu1 %v125_v17 }
  0x2e   :  { %192 = vmatpush.msra.mxu2 %v169_v30 }
  0x2f   :  { %155 = vmatpush.msra.mxu1 %v124_v18 }
  0x30   :  { %193 = vmatpush.msra.mxu2 %v168_v31 }
  0x31   :  { %156 = vmatpush.msra.mxu1 %v123_v19 }
  0x32   :  { %194 = vmatpush.msra.mxu2 %v167_v32 }
  0x33   :  { %157 = vmatpush.msra.mxu1 %v122_v20 }
  0x34   :  { %195 = vmatpush.msra.mxu2 %v166_v33 }
  0x36   :  { %196 = vmatpush.msra.mxu2 %v165_v38 }
  0x38   :  { %197 = vmatpush.msra.mxu2 %v164_v39 }
  0x3a   :  { %198 = vmatpush.msra.mxu2 %v163_v40 }
  0x98   :  { %v118_v35 = vpop.f32.mrf.mxu0 }
  0x99   :  { %v119_v36 = vadd.f32 %v231_v34, %v118_v35 }
  0x9b   :  { %v121_v37 = vmax.f32 %v119_v36, 0.0 }
  0x9d   :  { %158 = vmatmul.f32.vlgmr.msra.gmra.mxu1 %v121_v37 }
 0x11a   :  { %v159_v42 = vpop.f32.mrf.mxu1 }
 0x11b   :  { %v160_v43 = vadd.f32 %v232_v41, %v159_v42 }
 0x11d   :  { %v162_v44 = vmax.f32 %v160_v43, 0.0 }
 0x11f   :  { %199 = vmatmul.f32.vlgmr.msra.gmra.mxu2 %v162_v44 }
 0x1a2   :  { %v200_v46 = vpop.f32.mrf.mxu2 }
 0x1a3   :  { %v201_v47 = vadd.f32 %v233_v45, %v200_v46 }
 0x1a5   :  { %203 = vst [vmem:[#allocation10] sm:$0xff] %v201_v47 }
 0x1a6   :  { %214 = dma.vmem_to_hbm [thread:$0]  %s210_s25, 128, %s212_s28, [#allocation4]  }
 0x1a7   :  { %360 = dma.done.wait [#allocation4], 128  }
 0x1a8   :  { %361 = vsyncadd [#allocation4], 4294967168 }
 0x1a9   :  { %219 = vsyncpa [#allocation3], 1 }
 0x1aa   :  { %220 = vsyncpa [#allocation6], 1 }
 0x1ab   :  { %221 = vsyncpa [#allocation9], 1 }
 0x1ac   :  { %222 = vsyncpa [#allocation4], 1 }

// kernel: tpu_custom_call.1
= control target key start
LH: loop header
LB: loop body
LE: loop exit
PB: predicated region body
PF: predicated region fallthrough
CT: control target
= control target key end

     0   :  { %12 = vsyncpa [#allocation3], 0  ;;  %s433_s0 = inlined_call_operand.hbm [shape: f32[8,32], index: 0, kind: input, shape index: {}]   ;;  %s434_s1 = inlined_call_operand.hbm [shape: f32[32,128], index: 1, kind: input, shape index: {}]   ;;  %s435_s2 = inlined_call_operand.vmem [shape: f32[1,128], index: 2, kind: input, shape index: {}]   ;;  %s436_s3 = inlined_call_operand.hbm [shape: f32[128,128], index: 3, kind: input, shape index: {}]   ;;  %s437_s4 = inlined_call_operand.vmem [shape: f32[1,128], index: 4, kind: input, shape index: {}]   ;;  %s438_s5 = inlined_call_operand.hbm [shape: f32[128,128], index: 5, kind: input, shape index: {}]   ;;  %s439_s6 = inlined_call_operand.vmem [shape: f32[1,128], index: 6, kind: input, shape index: {}]   ;;  %s440_s7 = inlined_call_operand.hbm [shape: f32[8,128], index: 7, kind: output, shape index: {}]  }
   0x1   :  { %13 = vsyncpa [#allocation6], 0 }
   0x2   :  { %14 = vsyncpa [#allocation9], 0  ;;  %s31_s26 = sshll.u32 %s434_s1, 4  ;;  %s32_s26 = int_to_ptr.hbm [resolvable:$true] %s31_s26 }
   0x3   :  { %15 = vsyncpa [#allocation4], 0  ;;  %s362_s27 = smov [#allocation5]   ;;  %s21_s8 = sshll.u32 %s433_s0, 4  ;;  %s22_s8 = int_to_ptr.hbm [resolvable:$true] %s21_s8 }
   0x4   :  { %s33_s28 = sshll.u32 %s362_s27, 4  ;;  %s363_s9 = smov 128   ;;  %s34_s28 = int_to_ptr.vmem [resolvable:$true] %s33_s28 }
   0x5   :  { %s364_s10 = smov 8   ;;  %s365_s11 = smov [#allocation2]  }
   0x6   :  { %39 = dma.hbm_to_vmem [thread:$0]  %s32_s26, 512, %s34_s28, [#allocation6], %s363_s9, %s363_s9, %s364_s10  }
   0x7   :  { %s23_s12 = sshll.u32 %s365_s11, 4  ;;  %s46_s15 = sshll.u32 %s436_s3, 4  ;;  %s24_s12 = int_to_ptr.vmem [resolvable:$true] %s23_s12  ;;  %s47_s15 = int_to_ptr.hbm [resolvable:$true] %s46_s15 }
   0x8   :  { %26 = dma.hbm_to_vmem [thread:$0]  %s22_s8, 128, %s24_s12, [#allocation3]  }
   0x9   :  { %s61_s17 = sshll.u32 %s438_s5, 4  ;;  %s366_s18 = smov [#allocation7]   ;;  %s62_s17 = int_to_ptr.hbm [resolvable:$true] %s61_s17 }
   0xa   :  { %s48_s19 = sshll.u32 %s366_s18, 4  ;;  %s367_s0 = smov [#allocation8]   ;;  %s49_s19 = int_to_ptr.vmem [resolvable:$true] %s48_s19 }
   0xb   :  { %54 = dma.hbm_to_vmem [thread:$0]  %s47_s15, 2048, %s49_s19, [#allocation6], %s363_s9, %s363_s9, %s364_s10  }
   0xc   :  { %s63_s20 = sshll.u32 %s367_s0, 4  ;;  %s64_s20 = int_to_ptr.vmem [resolvable:$true] %s63_s20 }
   0xd   :  { %69 = dma.hbm_to_vmem [thread:$0]  %s62_s17, 2048, %s64_s20, [#allocation9], %s363_s9, %s363_s9, %s364_s10  }
   0xe   :  { %354 = dma.done.wait [#allocation3], 128  }
   0xf   :  { %355 = vsyncadd [#allocation3], 4294967168 }
  0x10   :  { %356 = dma.done.wait [#allocation6], 2560  }
  0x11   :  { %357 = vsyncadd [#allocation6], 4294964736 }
  0x12   :  { %358 = dma.done.wait [#allocation9], 2048  }
  0x13   :  { %359 = vsyncadd [#allocation9], 4294965248  ;;  %v91_v0 = vld [vmem:[#allocation5 + $0x18] sm:$0xff]  ;;  %v90_v1 = vld [vmem:[#allocation5 + $0x10] sm:$0xff]  ;;  %vm97_vm0 = vcmask 261120   ;;  %s368_s24 = smov [#allocation10]  }
  0x14   :  { %113 = vmatpush.msra.mxu0 %v91_v0  ;;  %v137_v2 = vld [vmem:[#allocation7 + $0x78] sm:$0xff]  ;;  %v89_v3 = vld [vmem:[#allocation5 + $0x8] sm:$0xff]  ;;  %v136_v4 = vld [vmem:[#allocation7 + $0x70] sm:$0xff]  ;;  %s209_s25 = sshll.u32 %s368_s24, 4  ;;  %s211_s28 = sshll.u32 %s440_s7, 4  ;;  %s210_s25 = int_to_ptr.vmem [resolvable:$true] %s209_s25  ;;  %s212_s28 = int_to_ptr.hbm [resolvable:$true] %s211_s28 }
  0x15   :  { %142 = vmatpush.msra.mxu1 %v137_v2  ;;  %v135_v5 = vld [vmem:[#allocation7 + $0x68] sm:$0xff]  ;;  %v88_v6 = vld [vmem:[#allocation5] sm:$0xff]  ;;  %v93_v7 = vld [vmem:[#allocation2] sm:$0xff] }
  0x16   :  { %114 = vmatpush.msra.mxu0 %v90_v1  ;;  %v134_v8 = vld [vmem:[#allocation7 + $0x60] sm:$0xff]  ;;  %v133_v9 = vld [vmem:[#allocation7 + $0x58] sm:$0xff]  ;;  %v132_v10 = vld [vmem:[#allocation7 + $0x50] sm:$0xff] }
  0x17   :  { %143 = vmatpush.msra.mxu1 %v136_v4  ;;  %v131_v11 = vld [vmem:[#allocation7 + $0x48] sm:$0xff]  ;;  %v130_v12 = vld [vmem:[#allocation7 + $0x40] sm:$0xff]  ;;  %v129_v13 = vld [vmem:[#allocation7 + $0x38] sm:$0xff] }
  0x18   :  { %115 = vmatpush.msra.mxu0 %v89_v3  ;;  %v128_v14 = vld [vmem:[#allocation7 + $0x30] sm:$0xff]  ;;  %v127_v15 = vld [vmem:[#allocation7 + $0x28] sm:$0xff]  ;;  %v126_v16 = vld [vmem:[#allocation7 + $0x20] sm:$0xff] }
  0x19   :  { %144 = vmatpush.msra.mxu1 %v135_v5  ;;  %v125_v17 = vld [vmem:[#allocation7 + $0x18] sm:$0xff]  ;;  %v124_v18 = vld [vmem:[#allocation7 + $0x10] sm:$0xff]  ;;  %v123_v19 = vld [vmem:[#allocation7 + $0x8] sm:$0xff] }
  0x1a   :  { %116 = vmatpush.msra.mxu0 %v88_v6  ;;  %v122_v20 = vld [vmem:[#allocation7] sm:$0xff]  ;;  %v178_v21 = vld [vmem:[#allocation8 + $0x78] sm:$0xff]  ;;  %v177_v22 = vld [vmem:[#allocation8 + $0x70] sm:$0xff] }
  0x1b   :  { %223 = vmatmul.msk.f32.vlgmr.msra.gmra.mxu0 %vm97_vm0, %v93_v7  ;;  %145 = vmatpush.msra.mxu1 %v134_v8  ;;  %v176_v23 = vld [vmem:[#allocation8 + $0x68] sm:$0xff]  ;;  %v175_v24 = vld [vmem:[#allocation8 + $0x60] sm:$0xff]  ;;  %v174_v25 = vld [vmem:[#allocation8 + $0x58] sm:$0xff] }
  0x1c   :  { %183 = vmatpush.msra.mxu2 %v178_v21  ;;  %v173_v26 = vld [vmem:[#allocation8 + $0x50] sm:$0xff]  ;;  %v172_v27 = vld [vmem:[#allocation8 + $0x48] sm:$0xff]  ;;  %v171_v28 = vld [vmem:[#allocation8 + $0x40] sm:$0xff] }
  0x1d   :  { %146 = vmatpush.msra.mxu1 %v133_v9  ;;  %v170_v29 = vld [vmem:[#allocation8 + $0x38] sm:$0xff]  ;;  %v169_v30 = vld [vmem:[#allocation8 + $0x30] sm:$0xff]  ;;  %v168_v31 = vld [vmem:[#allocation8 + $0x28] sm:$0xff] }
  0x1e   :  { %184 = vmatpush.msra.mxu2 %v177_v22  ;;  %v167_v32 = vld [vmem:[#allocation8 + $0x20] sm:$0xff]  ;;  %v166_v33 = vld [vmem:[#allocation8 + $0x18] sm:$0xff]  ;;  %v165_v38 = vld [vmem:[#allocation8 + $0x10] sm:$0xff] }
  0x1f   :  { %147 = vmatpush.msra.mxu1 %v132_v10  ;;  %v231_v34 = vld [vmem:[%s435_s2] ss:$0 sm:$0xff]  ;;  %v164_v39 = vld [vmem:[#allocation8 + $0x8] sm:$0xff]  ;;  %v163_v40 = vld [vmem:[#allocation8] sm:$0xff] }
  0x20   :  { %185 = vmatpush.msra.mxu2 %v176_v23  ;;  %v232_v41 = vld [vmem:[%s437_s4] ss:$0 sm:$0xff] }
  0x21   :  { %148 = vmatpush.msra.mxu1 %v131_v11  ;;  %v233_v45 = vld [vmem:[%s439_s6] ss:$0 sm:$0xff] }
  0x22   :  { %186 = vmatpush.msra.mxu2 %v175_v24 }
  0x23   :  { %149 = vmatpush.msra.mxu1 %v130_v12 }
  0x24   :  { %187 = vmatpush.msra.mxu2 %v174_v25 }
  0x25   :  { %150 = vmatpush.msra.mxu1 %v129_v13 }
  0x26   :  { %188 = vmatpush.msra.mxu2 %v173_v26 }
  0x27   :  { %151 = vmatpush.msra.mxu1 %v128_v14 }
  0x28   :  { %189 = vmatpush.msra.mxu2 %v172_v27 }
  0x29   :  { %152 = vmatpush.msra.mxu1 %v127_v15 }
  0x2a   :  { %190 = vmatpush.msra.mxu2 %v171_v28 }
  0x2b   :  { %153 = vmatpush.msra.mxu1 %v126_v16 }
  0x2c   :  { %191 = vmatpush.msra.mxu2 %v170_v29 }
  0x2d   :  { %154 = vmatpush.msra.mxu1 %v125_v17 }
  0x2e   :  { %192 = vmatpush.msra.mxu2 %v169_v30 }
  0x2f   :  { %155 = vmatpush.msra.mxu1 %v124_v18 }
  0x30   :  { %193 = vmatpush.msra.mxu2 %v168_v31 }
  0x31   :  { %156 = vmatpush.msra.mxu1 %v123_v19 }
  0x32   :  { %194 = vmatpush.msra.mxu2 %v167_v32 }
  0x33   :  { %157 = vmatpush.msra.mxu1 %v122_v20 }
  0x34   :  { %195 = vmatpush.msra.mxu2 %v166_v33 }
  0x36   :  { %196 = vmatpush.msra.mxu2 %v165_v38 }
  0x38   :  { %197 = vmatpush.msra.mxu2 %v164_v39 }
  0x3a   :  { %198 = vmatpush.msra.mxu2 %v163_v40 }
  0x98   :  { %v118_v35 = vpop.f32.mrf.mxu0 }
  0x99   :  { %v119_v36 = vadd.f32 %v231_v34, %v118_v35 }
  0x9b   :  { %v121_v37 = vmax.f32 %v119_v36, 0.0 }
  0x9d   :  { %158 = vmatmul.f32.vlgmr.msra.gmra.mxu1 %v121_v37 }
 0x11a   :  { %v159_v42 = vpop.f32.mrf.mxu1 }
 0x11b   :  { %v160_v43 = vadd.f32 %v232_v41, %v159_v42 }
 0x11d   :  { %v162_v44 = vmax.f32 %v160_v43, 0.0 }
 0x11f   :  { %199 = vmatmul.f32.vlgmr.msra.gmra.mxu2 %v162_v44 }
 0x1a2   :  { %v200_v46 = vpop.f32.mrf.mxu2 }
 0x1a3   :  { %v201_v47 = vadd.f32 %v233_v45, %v200_v46 }
 0x1a5   :  { %203 = vst [vmem:[#allocation10] sm:$0xff] %v201_v47 }
 0x1a6   :  { %214 = dma.vmem_to_hbm [thread:$0]  %s210_s25, 128, %s212_s28, [#allocation4]  }
 0x1a7   :  { %360 = dma.done.wait [#allocation4], 128  }
 0x1a8   :  { %361 = vsyncadd [#allocation4], 4294967168 }
 0x1a9   :  { %219 = vsyncpa [#allocation3], 1 }
 0x1aa   :  { %220 = vsyncpa [#allocation6], 1 }
 0x1ab   :  { %221 = vsyncpa [#allocation9], 1 }
 0x1ac   :  { %222 = vsyncpa [#allocation4], 1 }

</bundles_post_ra>
